<compile_context>
chip_gen: v7x
topology: tpu7x:2x2x1
jax: 0.10.0
libtpu: 0.0.40
codegen_flags: <defaults>
</compile_context>

<pallas_src>
import functools

import numpy as np
import jax
import jax.numpy as jnp
from jax.experimental import pallas as pl
from jax.experimental.pallas import tpu as pltpu


def actor_kernel(x_ref, w1_ref, b1_ref, w2_ref, b2_ref, w3_ref, b3_ref, out_ref):
    """Fused MLP forward: relu(xW1+b1) -> relu(.W2+b2) -> tanh(.W3+b3).

    x arrives f32 and is cast to bf16 in-kernel; weights are pre-cast bf16;
    accumulation and activations are f32.
    """
    x = x_ref[...].astype(jnp.bfloat16)                       # (TB, in) bf16

    h = jnp.dot(x, w1_ref[...], preferred_element_type=jnp.float32) + b1_ref[...]
    h = jnp.maximum(h, 0.0).astype(jnp.bfloat16)              # (TB, H0)

    h = jnp.dot(h, w2_ref[...], preferred_element_type=jnp.float32) + b2_ref[...]
    h = jnp.maximum(h, 0.0).astype(jnp.bfloat16)              # (TB, H1)

    y = jnp.dot(h, w3_ref[...], preferred_element_type=jnp.float32) + b3_ref[...]
    out_ref[...] = jnp.tanh(y)                                # (TB, Npad) f32


def prepare_actor_params(params):
    """One-time (per parameter update) preprocessing, hoisted off the hot path.

    - Casts the three weight matrices to bf16 (halves weight DMA bytes).
    - Zero-pads the output layer to a lane-dense width (multiple of 128) so the
      final MXU pass and the store path are unmasked.
    Returns (prepared_tensors_tuple, action_size).
    """
    (w1, b1), (w2, b2), (w3, b3) = params
    h1, action_size = w3.shape
    n_out = max(128, ((action_size + 127) // 128) * 128)

    w3p = jnp.zeros((h1, n_out), jnp.float32).at[:, :action_size].set(w3)
    b3p = jnp.zeros((1, n_out), jnp.float32).at[:, :action_size].set(b3)

    prepared = (
        w1.astype(jnp.bfloat16), b1.astype(jnp.float32),
        w2.astype(jnp.bfloat16), b2.astype(jnp.float32),
        w3p.astype(jnp.bfloat16), b3p.astype(jnp.float32),
    )
    return jax.tree_util.tree_map(jnp.asarray, prepared), action_size


def actor_forward(x, prepared, action_size, *, max_tb=512):
    """Run the fused Actor MLP. x: (B, 2*state_size) float32.

    `prepared` comes from prepare_actor_params. Returns (B, action_size) f32.
    """
    w1, b1, w2, b2, w3, b3 = prepared
    B, in_dim = x.shape
    h0 = w1.shape[1]
    h1 = w2.shape[1]
    n_out = w3.shape[1]

    # Batch tile: multiple of 16 (bf16 sublane packing); collapse grid to a
    # single step whenever the whole (padded) batch fits in one tile.
    b_pad = max(16, ((B + 15) // 16) * 16)
    if b_pad <= max_tb:
        tb = b_pad
    else:
        tb = max_tb
        b_pad = ((B + tb - 1) // tb) * tb
    if b_pad != B:
        x = jnp.pad(x, ((0, b_pad - B), (0, 0)))
    grid = (b_pad // tb,)

    flops = 2 * b_pad * (in_dim * h0 + h0 * h1 + h1 * n_out)
    bytes_accessed = (
        b_pad * in_dim * 4                       # x (f32)
        + w1.size * 2 + w2.size * 2 + w3.size * 2  # bf16 weights
        + b1.size * 4 + b2.size * 4 + b3.size * 4  # f32 biases
        + b_pad * n_out * 4                      # output (f32)
    )

    out = pl.pallas_call(
        actor_kernel,
        out_shape=jax.ShapeDtypeStruct((b_pad, n_out), jnp.float32),
        grid_spec=pltpu.PrefetchScalarGridSpec(
            num_scalar_prefetch=0,
            grid=grid,
            in_specs=[
                pl.BlockSpec((tb, in_dim), lambda i: (i, 0)),   # x: tiled on batch
                pl.BlockSpec((in_dim, h0), lambda i: (0, 0)),   # weights/biases stay
                pl.BlockSpec((1, h0), lambda i: (0, 0)),        # VMEM-resident across
                pl.BlockSpec((h0, h1), lambda i: (0, 0)),       # grid iterations
                pl.BlockSpec((1, h1), lambda i: (0, 0)),
                pl.BlockSpec((h1, n_out), lambda i: (0, 0)),
                pl.BlockSpec((1, n_out), lambda i: (0, 0)),
            ],
            out_specs=pl.BlockSpec((tb, n_out), lambda i: (i, 0)),
        ),
        compiler_params=pltpu.CompilerParams(
            dimension_semantics=("parallel",),   # batch axis shards across TCs (v7x)
            vmem_limit_bytes=32 << 20,
        ),
        cost_estimate=pl.CostEstimate(
            flops=flops,
            transcendentals=b_pad * n_out,
            bytes_accessed=bytes_accessed,
        ),
    )(x, w1, b1, w2, b2, w3, b3)

    # Cheap view-slice back to the logical shape; consumers that accept the
    # padded (B, 128) slab can skip this.
    return out[:B, :action_size]


def init_actor_params(key, state_size, action_size, hidden_layers=(256, 128)):
    """Parameter init mirroring the PyTorch module's scheme.

    Hidden layers except the last: uniform(+-1/sqrt(weight.size()[0]) ==
    +-1/sqrt(out_features)). Last HIDDEN layer: uniform(+-3e-3). Output layer:
    PyTorch's default Linear init. Biases: PyTorch default (+-1/sqrt(fan_in)).
    Weights are returned pre-transposed to (in_features, out_features).
    """
    sizes = [2 * state_size] + list(hidden_layers) + [action_size]
    params = []
    n_layers = len(sizes) - 1
    keys = jax.random.split(key, 2 * n_layers)
    for li in range(n_layers):
        fan_in, fan_out = sizes[li], sizes[li + 1]
        wk, bk = keys[2 * li], keys[2 * li + 1]
        if li < n_layers - 2:
            lim = 1.0 / np.sqrt(fan_out)   # hidden_init uses weight.size()[0]
        elif li == n_layers - 2:
            lim = 0.003                    # last hidden layer in the reference
        else:
            lim = 1.0 / np.sqrt(fan_in)    # output layer: default PyTorch init
        w = jax.random.uniform(wk, (fan_in, fan_out), jnp.float32, -lim, lim)
        b = jax.random.uniform(bk, (1, fan_out), jnp.float32,
                               -1.0 / np.sqrt(fan_in), 1.0 / np.sqrt(fan_in))
        params.append((w, b))
    return params


def actor_reference(x, params):
    """Pure-JAX f32 reference for correctness checking."""
    (w1, b1), (w2, b2), (w3, b3) = params
    h = jnp.maximum(x @ w1 + b1, 0.0)
    h = jnp.maximum(h @ w2 + b2, 0.0)
    return jnp.tanh(h @ w3 + b3)


if __name__ == "__main__":
    key = jax.random.PRNGKey(0)
    k_param, k_state = jax.random.split(key)

    state_size = 16      # module input dim is 2 * state_size = 32
    action_size = 4
    batch = 256          # fits one 256-row tile -> grid=(1,)
    hidden_layers = (256, 128)

    params = init_actor_params(k_param, state_size, action_size, hidden_layers)
    state = jax.random.normal(k_state, (batch, 2 * state_size), jnp.float32)

    # One-time preprocessing (off the hot path).
    prepared, act_size = prepare_actor_params(params)
    prepared = jax.block_until_ready(prepared)

    actor_fn = jax.jit(functools.partial(actor_forward, max_tb=512),
                       static_argnums=(2,))
    out = actor_fn(state, prepared, act_size)
    out = jax.block_until_ready(out)

    ref = actor_reference(state, params)
    # bf16 matmul operands with f32 accumulation -> loosened tolerance.
    np.testing.assert_allclose(np.asarray(out), np.asarray(ref),
                               rtol=2e-2, atol=2e-2)
    assert out.shape == (batch, action_size)
    print("KERNEL_OK")
</pallas_src>

<mosaic_0001>
module attributes {stable_mosaic.version = 11 : i64} {
  func.func @actor_kernel(%arg0: i32, %arg1: memref<256x32xf32, #tpu.memory_space<vmem>>, %arg2: memref<32x256xbf16, #tpu.memory_space<vmem>>, %arg3: memref<1x256xf32, #tpu.memory_space<vmem>>, %arg4: memref<256x128xbf16, #tpu.memory_space<vmem>>, %arg5: memref<1x128xf32, #tpu.memory_space<vmem>>, %arg6: memref<128x128xbf16, #tpu.memory_space<vmem>>, %arg7: memref<1x128xf32, #tpu.memory_space<vmem>>, %arg8: memref<256x128xf32, #tpu.memory_space<vmem>>) attributes {dimension_semantics = [#tpu.dimension_semantics<parallel>], iteration_bounds = array<i64: 1>, scalar_prefetch = 0 : i64, scratch_operands = 0 : i64, tpu.core_type = #tpu.core_type<tc>, window_params = [{transform_indices = @transform_0, window_bounds = array<i64: 256, 32>}, {pipeline_mode = #tpu.pipeline_mode<synchronous>, transform_indices = @transform_1, window_bounds = array<i64: 32, 256>}, {pipeline_mode = #tpu.pipeline_mode<synchronous>, transform_indices = @transform_2, window_bounds = array<i64: 1, 256>}, {pipeline_mode = #tpu.pipeline_mode<synchronous>, transform_indices = @transform_3, window_bounds = array<i64: 256, 128>}, {pipeline_mode = #tpu.pipeline_mode<synchronous>, transform_indices = @transform_4, window_bounds = array<i64: 1, 128>}, {pipeline_mode = #tpu.pipeline_mode<synchronous>, transform_indices = @transform_5, window_bounds = array<i64: 128, 128>}, {pipeline_mode = #tpu.pipeline_mode<synchronous>, transform_indices = @transform_6, window_bounds = array<i64: 1, 128>}, {transform_indices = @transform_7, window_bounds = array<i64: 256, 128>}]} {
    %c0 = arith.constant 0 : index
    %c0_0 = arith.constant 0 : index
    %0 = vector.load %arg1[%c0, %c0_0] : memref<256x32xf32, #tpu.memory_space<vmem>>, vector<256x32xf32>
    %1 = arith.truncf %0 : vector<256x32xf32> to vector<256x32xbf16>
    %c0_1 = arith.constant 0 : index
    %c0_2 = arith.constant 0 : index
    %2 = vector.load %arg2[%c0_1, %c0_2] : memref<32x256xbf16, #tpu.memory_space<vmem>>, vector<32x256xbf16>
    %cst = arith.constant dense<0.000000e+00> : vector<256x256xf32>
    %3 = tpu.matmul %1, %2, %cst {dimension_numbers = #tpu.dot_dimension_numbers<[1], [0], [0], [1], [0, 0, 1, 1], [], []>} : vector<256x32xbf16>, vector<32x256xbf16>, vector<256x256xf32> -> vector<256x256xf32>
    %c0_3 = arith.constant 0 : index
    %c0_4 = arith.constant 0 : index
    %4 = vector.load %arg3[%c0_3, %c0_4] : memref<1x256xf32, #tpu.memory_space<vmem>>, vector<1x256xf32>
    %5 = vector.broadcast %4 : vector<1x256xf32> to vector<256x256xf32>
    %6 = arith.addf %3, %5 : vector<256x256xf32>
    %cst_5 = arith.constant 0.000000e+00 : f32
    %7 = vector.broadcast %cst_5 : f32 to vector<256x256xf32>
    %8 = arith.maximumf %6, %7 : vector<256x256xf32>
    %9 = arith.truncf %8 : vector<256x256xf32> to vector<256x256xbf16>
    %c0_6 = arith.constant 0 : index
    %c0_7 = arith.constant 0 : index
    %10 = vector.load %arg4[%c0_6, %c0_7] : memref<256x128xbf16, #tpu.memory_space<vmem>>, vector<256x128xbf16>
    %cst_8 = arith.constant dense<0.000000e+00> : vector<256x128xf32>
    %11 = tpu.matmul %9, %10, %cst_8 {dimension_numbers = #tpu.dot_dimension_numbers<[1], [0], [0], [1], [0, 0, 1, 1], [], []>} : vector<256x256xbf16>, vector<256x128xbf16>, vector<256x128xf32> -> vector<256x128xf32>
    %c0_9 = arith.constant 0 : index
    %c0_10 = arith.constant 0 : index
    %12 = vector.load %arg5[%c0_9, %c0_10] : memref<1x128xf32, #tpu.memory_space<vmem>>, vector<1x128xf32>
    %13 = vector.broadcast %12 : vector<1x128xf32> to vector<256x128xf32>
    %14 = arith.addf %11, %13 : vector<256x128xf32>
    %cst_11 = arith.constant 0.000000e+00 : f32
    %15 = vector.broadcast %cst_11 : f32 to vector<256x128xf32>
    %16 = arith.maximumf %14, %15 : vector<256x128xf32>
    %17 = arith.truncf %16 : vector<256x128xf32> to vector<256x128xbf16>
    %c0_12 = arith.constant 0 : index
    %c0_13 = arith.constant 0 : index
    %18 = vector.load %arg6[%c0_12, %c0_13] : memref<128x128xbf16, #tpu.memory_space<vmem>>, vector<128x128xbf16>
    %cst_14 = arith.constant dense<0.000000e+00> : vector<256x128xf32>
    %19 = tpu.matmul %17, %18, %cst_14 {dimension_numbers = #tpu.dot_dimension_numbers<[1], [0], [0], [1], [0, 0, 1, 1], [], []>} : vector<256x128xbf16>, vector<128x128xbf16>, vector<256x128xf32> -> vector<256x128xf32>
    %c0_15 = arith.constant 0 : index
    %c0_16 = arith.constant 0 : index
    %20 = vector.load %arg7[%c0_15, %c0_16] : memref<1x128xf32, #tpu.memory_space<vmem>>, vector<1x128xf32>
    %21 = vector.broadcast %20 : vector<1x128xf32> to vector<256x128xf32>
    %22 = arith.addf %19, %21 : vector<256x128xf32>
    %23 = math.tanh %22 : vector<256x128xf32>
    %c0_17 = arith.constant 0 : index
    %c0_18 = arith.constant 0 : index
    %24 = vector.load %arg8[%c0_17, %c0_18] : memref<256x128xf32, #tpu.memory_space<vmem>>, vector<256x128xf32>
    tpu.vector_store %arg8[%c0_17, %c0_18], %23 {strides = array<i32>} : memref<256x128xf32, #tpu.memory_space<vmem>>, vector<256x128xf32>,
    return
  }
  func.func @transform_0(%arg0: i32) -> (i32, i32) {
    %c0_i32 = arith.constant 0 : i32
    %c0_i32_0 = arith.constant 0 : i32
    return %arg0, %c0_i32 : i32, i32
  }
  func.func @transform_1(%arg0: i32) -> (i32, i32) {
    %c0_i32 = arith.constant 0 : i32
    %c0_i32_0 = arith.constant 0 : i32
    %c0_i32_1 = arith.constant 0 : i32
    return %c0_i32, %c0_i32_0 : i32, i32
  }
  func.func @transform_2(%arg0: i32) -> (i32, i32) {
    %c0_i32 = arith.constant 0 : i32
    %c0_i32_0 = arith.constant 0 : i32
    %c0_i32_1 = arith.constant 0 : i32
    return %c0_i32, %c0_i32_0 : i32, i32
  }
  func.func @transform_3(%arg0: i32) -> (i32, i32) {
    %c0_i32 = arith.constant 0 : i32
    %c0_i32_0 = arith.constant 0 : i32
    %c0_i32_1 = arith.constant 0 : i32
    return %c0_i32, %c0_i32_0 : i32, i32
  }
  func.func @transform_4(%arg0: i32) -> (i32, i32) {
    %c0_i32 = arith.constant 0 : i32
    %c0_i32_0 = arith.constant 0 : i32
    %c0_i32_1 = arith.constant 0 : i32
    return %c0_i32, %c0_i32_0 : i32, i32
  }
  func.func @transform_5(%arg0: i32) -> (i32, i32) {
    %c0_i32 = arith.constant 0 : i32
    %c0_i32_0 = arith.constant 0 : i32
    %c0_i32_1 = arith.constant 0 : i32
    return %c0_i32, %c0_i32_0 : i32, i32
  }
  func.func @transform_6(%arg0: i32) -> (i32, i32) {
    %c0_i32 = arith.constant 0 : i32
    %c0_i32_0 = arith.constant 0 : i32
    %c0_i32_1 = arith.constant 0 : i32
    return %c0_i32, %c0_i32_0 : i32, i32
  }
  func.func @transform_7(%arg0: i32) -> (i32, i32) {
    %c0_i32 = arith.constant 0 : i32
    %c0_i32_0 = arith.constant 0 : i32
    return %arg0, %c0_i32 : i32, i32
  }
}

</mosaic_0001>

<bundles_post_ra>
// kernel: actor_forward.1
= control target key start
LH: loop header
LB: loop body
LE: loop exit
PB: predicated region body
PF: predicated region fallthrough
CT: control target
= control target key end

     0   :  { %v1422_v1 = vmov 0   ;;  %vm111_vm0 = vcmask 261120   ;;  %s1940_s1 = inlined_call_operand.vmem [shape: bf16[32,256], index: 1, kind: input, shape index: {}]   ;;  %s1941_s0 = inlined_call_operand.vmem [shape: f32[256,32], index: 0, kind: input, shape index: {}]   ;;  %s1942_s3 = inlined_call_operand.vmem [shape: bf16[256,128], index: 3, kind: input, shape index: {}]   ;;  %s1943_s2 = inlined_call_operand.vmem [shape: f32[1,256], index: 2, kind: input, shape index: {}]   ;;  %s1944_s5 = inlined_call_operand.vmem [shape: bf16[128,128], index: 5, kind: input, shape index: {}]   ;;  %s1945_s4 = inlined_call_operand.vmem [shape: f32[1,128], index: 4, kind: input, shape index: {}]   ;;  %s1946_s6 = inlined_call_operand.vmem [shape: f32[1,128], index: 6, kind: input, shape index: {}]   ;;  %s1947_s7 = inlined_call_operand.vmem [shape: f32[256,128], index: 7, kind: output, shape index: {}]  }
   0x1   :  { %v1328_v0 = vld [vmem:[%s1940_s1 + $0x4] ss:$8 sps:$4 sm:$0xff]   ;;  %192 = vmatprep.mubr.bf16.mxu0 %v1422_v1  ;;  %312 = vmatprep.mubr.bf16.mxu1 %v1422_v1  ;;  %v1330_v2 = vld [vmem:[%s1940_s1] ss:$8 sps:$4 sm:$0xff]   ;;  %v1331_v3 = vld [vmem:[%s1940_s1 + $0x14] ss:$8 sps:$4 sm:$0xff]  }
   0x2   :  { %160 = vmatprep.subr.bf16.mxu0 %v1328_v0  ;;  %1323 = vmatprep.subr.bf16.mxu1 %v1328_v0  ;;  %v1333_v4 = vld [vmem:[%s1940_s1 + $0x10] ss:$8 sps:$4 sm:$0xff]   ;;  %v27_v5 = vld [vmem:[%s1941_s0] sm:$0xff]  ;;  %v28_v6 = vld [vmem:[%s1941_s0 + $0x8] sm:$0xff] }
   0x3   :  { %161 = vmatpush1.bf16.msra.mxu0 %v1330_v2  ;;  %1325 = vmatpush1.bf16.msra.mxu1 %v1330_v2  ;;  %v59_v7 = vpack.c.bf16 %v28_v6, %v27_v5  ;;  %v51_v8 = vld [vmem:[%s1941_s0 + $0xc0] sm:$0xff]  ;;  %v29_v9 = vld [vmem:[%s1941_s0 + $0x10] sm:$0xff]  ;;  %v30_v10 = vld [vmem:[%s1941_s0 + $0x18] sm:$0xff]  ;;  %v81_v5 = vlaneseq }
   0x4   :  { %162 = vmatprep.subr.bf16.mxu0 %v1331_v3  ;;  %1324 = vmatprep.subr.bf16.mxu1 %v1331_v3  ;;  %v52_v11 = vld [vmem:[%s1941_s0 + $0xc8] sm:$0xff]  ;;  %v53_v13 = vld [vmem:[%s1941_s0 + $0xd0] sm:$0xff]  ;;  %v54_v14 = vld [vmem:[%s1941_s0 + $0xd8] sm:$0xff]  ;;  %v60_v15 = vpack.c.bf16 %v30_v10, %v29_v9 }
   0x5   :  { %v71_v12 = vpack.c.bf16 %v52_v11, %v51_v8  ;;  %v1334_v16 = vld [vmem:[%s1942_s3 + $0x40] sm:$0xff]   ;;  %v1336_v18 = vld [vmem:[%s1942_s3 + $0x48] sm:$0xff]   ;;  %v72_v21 = vpack.c.bf16 %v54_v14, %v53_v13  ;;  %v1338_v22 = vld [vmem:[%s1942_s3 + $0x50] sm:$0xff]   ;;  %v82_v6 = vshrl.u32 %v81_v5, 7 }
   0x6   :  { %v1335_v17 = vld [vmem:[%s1942_s3] sm:$0xff]   ;;  %v1337_v20 = vld [vmem:[%s1942_s3 + $0x8] sm:$0xff]   ;;  %v1339_v25 = vld [vmem:[%s1942_s3 + $0x10] sm:$0xff]  }
   0x7   :  { %163 = vmatpush1.bf16.msra.mxu0 %v1333_v4  ;;  %1326 = vmatpush1.bf16.msra.mxu1 %v1333_v4  ;;  %v31_v19 = vld [vmem:[%s1941_s0 + $0x20] sm:$0xff]  ;;  %v32_v23 = vld [vmem:[%s1941_s0 + $0x28] sm:$0xff]  ;;  %v1340_v27 = vld [vmem:[%s1942_s3 + $0x58] sm:$0xff]   ;;  %v87_v9 = vsub.s32 1, %v82_v6 }
   0x8   :  { %1139 = vmatprep.subr.bf16.mxu1 %v1334_v16  ;;  %v55_v24 = vld [vmem:[%s1941_s0 + $0xe0] sm:$0xff]  ;;  %v61_v26 = vpack.c.bf16 %v32_v23, %v31_v19  ;;  %v56_v28 = vld [vmem:[%s1941_s0 + $0xe8] sm:$0xff]  ;;  %v33_v29 = vld [vmem:[%s1941_s0 + $0x30] sm:$0xff] }
   0x9   :  { %v34_v30 = vld [vmem:[%s1941_s0 + $0x38] sm:$0xff]  ;;  %v1342_v32 = vld [vmem:[%s1942_s3 + $0x60] sm:$0xff]   ;;  %v73_v33 = vpack.c.bf16 %v56_v28, %v55_v24  ;;  %v1344_v36 = vld [vmem:[%s1942_s3 + $0x68] sm:$0xff]  }
   0xa   :  { %1097 = vmatmul.mubr.msk.bf16.vlgmr.msra.gmra.mrb[0].mxu0 %vm111_vm0, %v59_v7  ;;  %1109 = vmatmul.mubr.msk.bf16.vlgmr.msra.gmra.mrb[0].mxu1 %vm111_vm0, %v71_v12  ;;  %v1341_v31 = vld [vmem:[%s1942_s3 + $0x18] sm:$0xff]   ;;  %v1343_v34 = vld [vmem:[%s1942_s3 + $0x20] sm:$0xff]   ;;  %v62_v35 = vpack.c.bf16 %v34_v30, %v33_v29  ;;  %v57_v37 = vld [vmem:[%s1941_s0 + $0xf0] sm:$0xff]  ;;  %v83_v7 = vsub.s32 0, %v82_v6 }
   0xb   :  { %202 = vmatprep.mubr.bf16.mxu0 %v1422_v1  ;;  %322 = vmatprep.mubr.bf16.mxu1 %v1422_v1  ;;  %v58_v38 = vld [vmem:[%s1941_s0 + $0xf8] sm:$0xff]  ;;  %v1345_v39 = vld [vmem:[%s1942_s3 + $0x28] sm:$0xff]   ;;  %v35_v41 = vld [vmem:[%s1941_s0 + $0x40] sm:$0xff] }
   0xc   :  { %1140 = vmatpush3.bf16.msra.mxu1 %v1335_v17  ;;  %v74_v40 = vpack.c.bf16 %v58_v38, %v57_v37  ;;  %v36_v42 = vld [vmem:[%s1941_s0 + $0x48] sm:$0xff]  ;;  %v37_v44 = vld [vmem:[%s1941_s0 + $0x50] sm:$0xff]  ;;  %v38_v45 = vld [vmem:[%s1941_s0 + $0x58] sm:$0xff] }
   0xd   :  { %1141 = vmatprep.subr.bf16.mxu1 %v1336_v18  ;;  %v63_v43 = vpack.c.bf16 %v36_v42, %v35_v41  ;;  %v64_v46 = vpack.c.bf16 %v38_v45, %v37_v44  ;;  %v39_v47 = vld [vmem:[%s1941_s0 + $0x60] sm:$0xff]  ;;  %v40_v48 = vld [vmem:[%s1941_s0 + $0x68] sm:$0xff]  ;;  %v41_v50 = vld [vmem:[%s1941_s0 + $0x70] sm:$0xff] }
   0xe   :  { %v65_v49 = vpack.c.bf16 %v40_v48, %v39_v47  ;;  %v42_v51 = vld [vmem:[%s1941_s0 + $0x78] sm:$0xff]  ;;  %v43_v53 = vld [vmem:[%s1941_s0 + $0x80] sm:$0xff]  ;;  %v44_v54 = vld [vmem:[%s1941_s0 + $0x88] sm:$0xff] }
   0xf   :  { %v66_v52 = vpack.c.bf16 %v42_v51, %v41_v50  ;;  %v67_v55 = vpack.c.bf16 %v44_v54, %v43_v53  ;;  %v45_v56 = vld [vmem:[%s1941_s0 + $0x90] sm:$0xff]  ;;  %v46_v57 = vld [vmem:[%s1941_s0 + $0x98] sm:$0xff]  ;;  %v47_v59 = vld [vmem:[%s1941_s0 + $0xa0] sm:$0xff] }
  0x10   :  { %1142 = vmatpush3.bf16.msra.mxu1 %v1337_v20  ;;  %v68_v58 = vpack.c.bf16 %v46_v57, %v45_v56  ;;  %v48_v60 = vld [vmem:[%s1941_s0 + $0xa8] sm:$0xff]  ;;  %v49_v62 = vld [vmem:[%s1941_s0 + $0xb0] sm:$0xff]  ;;  %v50_v63 = vld [vmem:[%s1941_s0 + $0xb8] sm:$0xff] }
  0x11   :  { %1143 = vmatprep.subr.bf16.mxu1 %v1338_v22  ;;  %v69_v61 = vpack.c.bf16 %v48_v60, %v47_v59  ;;  %v70_v0 = vpack.c.bf16 %v50_v63, %v49_v62  ;;  %v1346_v2 = vld [vmem:[%s1942_s3 + $0x70] sm:$0xff]   ;;  %v1349_v4 = vld [vmem:[%s1942_s3 + $0x38] sm:$0xff]   ;;  %v79_v8 = vld [vmem:[%s1943_s2] sm:$0x3] }
  0x12   :  { %1098 = vmatmul.mubr.msk.bf16.gmra.mrb[4].mxu0 %vm111_vm0, %v60_v15  ;;  %1110 = vmatmul.mubr.msk.bf16.gmra.mrb[4].mxu1 %vm111_vm0, %v72_v21  ;;  %v1347_v3 = vld [vmem:[%s1942_s3 + $0x30] sm:$0xff]   ;;  %v1654_v10 = vrot.slane %v79_v8, %v83_v7  ;;  %v1656_v11 = vrot.slane %v79_v8, %v87_v9 }
  0x13   :  { %212 = vmatprep.mubr.bf16.mxu0 %v1422_v1  ;;  %332 = vmatprep.mubr.bf16.mxu1 %v1422_v1 }
  0x14   :  { %1144 = vmatpush3.bf16.msra.mxu1 %v1339_v25 }
  0x15   :  { %1145 = vmatprep.subr.bf16.mxu1 %v1340_v27  ;;  %v1351_v27 = vld [vmem:[%s1944_s5 + $0x8] sm:$0xff]  }
  0x18   :  { %1146 = vmatpush3.bf16.msra.mxu1 %v1341_v31 }
  0x19   :  { %1147 = vmatprep.subr.bf16.mxu1 %v1342_v32 }
  0x1a   :  { %1099 = vmatmul.mubr.msk.bf16.gmra.mrb[8].mxu0 %vm111_vm0, %v61_v26  ;;  %1111 = vmatmul.mubr.msk.bf16.gmra.mrb[8].mxu1 %vm111_vm0, %v73_v33  ;;  %v1350_v26 = vld [vmem:[%s1944_s5] sm:$0xff]  }
  0x1b   :  { %222 = vmatprep.mubr.bf16.mxu0 %v1422_v1  ;;  %342 = vmatprep.mubr.bf16.mxu1 %v1422_v1 }
  0x1c   :  { %1148 = vmatpush3.bf16.msra.mxu1 %v1343_v34  ;;  %1275 = vmatprep.subr.bf16.mxu0 %v1350_v26 }
  0x1d   :  { %1149 = vmatprep.subr.bf16.mxu1 %v1344_v36  ;;  %1276 = vmatpush3.bf16.msra.mxu0 %v1350_v26 }
  0x1e   :  { %1277 = vmatprep.subr.bf16.mxu0 %v1351_v27 }
  0x20   :  { %1150 = vmatpush3.bf16.msra.mxu1 %v1345_v39 }
  0x21   :  { %1151 = vmatprep.subr.bf16.mxu1 %v1346_v2  ;;  %1278 = vmatpush3.bf16.msra.mxu0 %v1351_v27 }
  0x22   :  { %1100 = vmatmul.mubr.msk.bf16.gmra.mrb[12].mxu0 %vm111_vm0, %v62_v35  ;;  %1112 = vmatmul.mubr.msk.bf16.gmra.mrb[12].mxu1 %vm111_vm0, %v74_v40  ;;  %v1352_v35 = vld [vmem:[%s1944_s5 + $0x10] sm:$0xff]  }
  0x23   :  { %232 = vmatprep.mubr.bf16.mxu0 %v1422_v1  ;;  %1279 = vmatprep.subr.bf16.mxu0 %v1352_v35 }
  0x24   :  { %1152 = vmatpush3.bf16.msra.mxu1 %v1347_v3 }
  0x25   :  { %1280 = vmatpush3.bf16.msra.mxu0 %v1352_v35 }
  0x2a   :  { %1101 = vmatmul.mubr.msk.bf16.gmra.mrb[16].mxu0 %vm111_vm0, %v63_v43 }
  0x2b   :  { %242 = vmatprep.mubr.bf16.mxu0 %v1422_v1 }
  0x32   :  { %1102 = vmatmul.mubr.msk.bf16.gmra.mrb[20].mxu0 %vm111_vm0, %v64_v46 }
  0x33   :  { %252 = vmatprep.mubr.bf16.mxu0 %v1422_v1 }
  0x3a   :  { %1103 = vmatmul.mubr.msk.bf16.gmra.mrb[24].mxu0 %vm111_vm0, %v65_v49 }
  0x3b   :  { %262 = vmatprep.mubr.bf16.mxu0 %v1422_v1 }
  0x42   :  { %1104 = vmatmul.mubr.msk.bf16.gmra.mrb[28].mxu0 %vm111_vm0, %v66_v52 }
  0x43   :  { %272 = vmatprep.mubr.bf16.mxu0 %v1422_v1 }
  0x4a   :  { %1105 = vmatmul.mubr.msk.bf16.gmra.mrb[32].mxu0 %vm111_vm0, %v67_v55 }
  0x4b   :  { %282 = vmatprep.mubr.bf16.mxu0 %v1422_v1 }
  0x52   :  { %1106 = vmatmul.mubr.msk.bf16.gmra.mrb[36].mxu0 %vm111_vm0, %v68_v58 }
  0x53   :  { %292 = vmatprep.mubr.bf16.mxu0 %v1422_v1 }
  0x5a   :  { %1107 = vmatmul.mubr.msk.bf16.gmra.mrb[40].mxu0 %vm111_vm0, %v69_v61 }
  0x5b   :  { %302 = vmatprep.mubr.bf16.mxu0 %v1422_v1  ;;  %v1348_v1 = vld [vmem:[%s1942_s3 + $0x78] sm:$0xff]  }
  0x5c   :  { %1153 = vmatprep.subr.bf16.mxu1 %v1348_v1 }
  0x5d   :  { %1154 = vmatpush3.bf16.msra.mxu1 %v1349_v4 }
  0x62   :  { %1108 = vmatmul.mubr.msk.bf16.gmra.mrb[44].mxu0 %vm111_vm0, %v70_v0 }
  0xdd   :  { %v194_v12 = vpop.f32.mrb[0].mxu0  ;;  %v314_v22 = vpop.f32.mrb[0].mxu1 }
  0xde   :  { %v195_v13 = vadd.f32 %v194_v12, %v1654_v10  ;;  %v196_v14 = vpop.f32.mrb[1].mxu0  ;;  %v315_v24 = vadd.f32 %v314_v22, %v1654_v10  ;;  %v316_v25 = vpop.f32.mrb[1].mxu1 }
  0xdf   :  { %v197_v15 = vadd.f32 %v196_v14, %v1656_v11  ;;  %v198_v16 = vpop.f32.mrb[2].mxu0  ;;  %v317_v29 = vadd.f32 %v316_v25, %v1656_v11  ;;  %v318_v30 = vpop.f32.mrb[2].mxu1 }
  0xe0   :  { %v353_v17 = vmax.f32 %v195_v13, 0.0  ;;  %v199_v18 = vadd.f32 %v198_v16, %v1654_v10  ;;  %v200_v19 = vpop.f32.mrb[3].mxu0  ;;  %v401_v32 = vmax.f32 %v315_v24, 0.0  ;;  %v319_v33 = vadd.f32 %v318_v30, %v1654_v10  ;;  %v320_v34 = vpop.f32.mrb[3].mxu1 }
  0xe1   :  { %v354_v20 = vmax.f32 %v197_v15, 0.0  ;;  %v201_v21 = vadd.f32 %v200_v19, %v1656_v11  ;;  %v402_v38 = vmax.f32 %v317_v29, 0.0  ;;  %v321_v39 = vadd.f32 %v320_v34, %v1656_v11 }
  0xe2   :  { %v355_v23 = vmax.f32 %v199_v18, 0.0  ;;  %v403_v42 = vmax.f32 %v319_v33, 0.0 }
  0xe3   :  { %v356_v28 = vmax.f32 %v201_v21, 0.0  ;;  %v404_v45 = vmax.f32 %v321_v39, 0.0 }
  0xe4   :  { %v417_v31 = vpack.c.bf16 %v355_v23, %v353_v17  ;;  %v1678_v48 = vpack.c.bf16 %v403_v42, %v401_v32 }
  0xe5   :  { %v418_v36 = vpack.c.bf16 %v356_v28, %v354_v20  ;;  %v204_v37 = vpop.f32.mrb[4].mxu0  ;;  %v1681_v50 = vpack.c.bf16 %v404_v45, %v402_v38  ;;  %v324_v51 = vpop.f32.mrb[4].mxu1 }
  0xe6   :  { %v205_v40 = vadd.f32 %v204_v37, %v1654_v10  ;;  %v206_v41 = vpop.f32.mrb[5].mxu0  ;;  %v325_v54 = vadd.f32 %v324_v51, %v1654_v10  ;;  %v326_v55 = vpop.f32.mrb[5].mxu1 }
  0xe7   :  { %v207_v43 = vadd.f32 %v206_v41, %v1656_v11  ;;  %v208_v44 = vpop.f32.mrb[6].mxu0  ;;  %616 = vmatprep.mubr.bf16.mxu1 %v418_v36  ;;  %v327_v58 = vadd.f32 %v326_v55, %v1656_v11  ;;  %v328_v59 = vpop.f32.mrb[6].mxu1 }
  0xe8   :  { %v209_v46 = vadd.f32 %v208_v44, %v1654_v10  ;;  %v210_v47 = vpop.f32.mrb[7].mxu0  ;;  %617 = vmatmul.mubr.bf16.vlgmr.msra.gmra.mrb[16].mxu1 %v417_v31  ;;  %v357_v52 = vmax.f32 %v205_v40, 0.0  ;;  %v405_v61 = vmax.f32 %v325_v54, 0.0  ;;  %v329_v62 = vadd.f32 %v328_v59, %v1654_v10  ;;  %v330_v63 = vpop.f32.mrb[7].mxu1 }
  0xe9   :  { %v211_v49 = vadd.f32 %v210_v47, %v1656_v11  ;;  %v358_v56 = vmax.f32 %v207_v43, 0.0  ;;  %v406_v3 = vmax.f32 %v327_v58, 0.0  ;;  %v331_v1 = vadd.f32 %v330_v63, %v1656_v11 }
  0xea   :  { %v359_v53 = vmax.f32 %v209_v46, 0.0  ;;  %v407_v6 = vmax.f32 %v329_v62, 0.0 }
  0xeb   :  { %v360_v57 = vmax.f32 %v211_v49, 0.0  ;;  %v408_v9 = vmax.f32 %v331_v1, 0.0 }
  0xec   :  { %v419_v60 = vpack.c.bf16 %v359_v53, %v357_v52  ;;  %v1690_v14 = vpack.c.bf16 %v407_v6, %v405_v61 }
  0xed   :  { %v420_v0 = vpack.c.bf16 %v360_v57, %v358_v56  ;;  %v214_v2 = vpop.f32.mrb[8].mxu0  ;;  %v1693_v16 = vpack.c.bf16 %v408_v9, %v406_v3  ;;  %v334_v17 = vpop.f32.mrb[8].mxu1 }
  0xee   :  { %v215_v4 = vadd.f32 %v214_v2, %v1654_v10  ;;  %v216_v5 = vpop.f32.mrb[9].mxu0  ;;  %v335_v20 = vadd.f32 %v334_v17, %v1654_v10  ;;  %v336_v21 = vpop.f32.mrb[9].mxu1 }
  0xef   :  { %v217_v7 = vadd.f32 %v216_v5, %v1656_v11  ;;  %v218_v8 = vpop.f32.mrb[10].mxu0  ;;  %624 = vmatprep.mubr.bf16.mxu1 %v420_v0  ;;  %v337_v24 = vadd.f32 %v336_v21, %v1656_v11  ;;  %v338_v25 = vpop.f32.mrb[10].mxu1 }
  0xf0   :  { %v219_v12 = vadd.f32 %v218_v8, %v1654_v10  ;;  %v220_v13 = vpop.f32.mrb[11].mxu0  ;;  %625 = vmatmul.mubr.bf16.gmra.mrb[20].mxu1 %v419_v60  ;;  %v361_v18 = vmax.f32 %v215_v4, 0.0  ;;  %v409_v27 = vmax.f32 %v335_v20, 0.0  ;;  %v339_v28 = vadd.f32 %v338_v25, %v1654_v10  ;;  %v340_v29 = vpop.f32.mrb[11].mxu1 }
  0xf1   :  { %v221_v15 = vadd.f32 %v220_v13, %v1656_v11  ;;  %v362_v22 = vmax.f32 %v217_v7, 0.0  ;;  %v410_v32 = vmax.f32 %v337_v24, 0.0  ;;  %v341_v33 = vadd.f32 %v340_v29, %v1656_v11 }
  0xf2   :  { %v363_v19 = vmax.f32 %v219_v12, 0.0  ;;  %v411_v36 = vmax.f32 %v339_v28, 0.0 }
  0xf3   :  { %v364_v23 = vmax.f32 %v221_v15, 0.0  ;;  %v412_v39 = vmax.f32 %v341_v33, 0.0 }
  0xf4   :  { %v421_v26 = vpack.c.bf16 %v363_v19, %v361_v18  ;;  %v1702_v42 = vpack.c.bf16 %v411_v36, %v409_v27 }
  0xf5   :  { %v422_v30 = vpack.c.bf16 %v364_v23, %v362_v22  ;;  %v224_v31 = vpop.f32.mrb[12].mxu0  ;;  %v1705_v44 = vpack.c.bf16 %v412_v39, %v410_v32  ;;  %v344_v45 = vpop.f32.mrb[12].mxu1 }
  0xf6   :  { %v225_v34 = vadd.f32 %v224_v31, %v1654_v10  ;;  %v226_v35 = vpop.f32.mrb[13].mxu0  ;;  %v345_v49 = vadd.f32 %v344_v45, %v1654_v10  ;;  %v346_v51 = vpop.f32.mrb[13].mxu1 }
  0xf7   :  { %v227_v37 = vadd.f32 %v226_v35, %v1656_v11  ;;  %v228_v38 = vpop.f32.mrb[14].mxu0  ;;  %632 = vmatprep.mubr.bf16.mxu1 %v422_v30  ;;  %v347_v54 = vadd.f32 %v346_v51, %v1656_v11  ;;  %v348_v55 = vpop.f32.mrb[14].mxu1 }
  0xf8   :  { %v229_v40 = vadd.f32 %v228_v38, %v1654_v10  ;;  %v230_v41 = vpop.f32.mrb[15].mxu0  ;;  %633 = vmatmul.mubr.bf16.gmra.mrb[24].mxu1 %v421_v26  ;;  %v365_v46 = vmax.f32 %v225_v34, 0.0  ;;  %v413_v57 = vmax.f32 %v345_v49, 0.0  ;;  %v349_v58 = vadd.f32 %v348_v55, %v1654_v10  ;;  %v350_v59 = vpop.f32.mrb[15].mxu1 }
  0xf9   :  { %v231_v43 = vadd.f32 %v230_v41, %v1656_v11  ;;  %v366_v52 = vmax.f32 %v227_v37, 0.0  ;;  %v414_v62 = vmax.f32 %v347_v54, 0.0  ;;  %v351_v63 = vadd.f32 %v350_v59, %v1656_v11 }
  0xfa   :  { %v367_v47 = vmax.f32 %v229_v40, 0.0  ;;  %v415_v3 = vmax.f32 %v349_v58, 0.0 }
  0xfb   :  { %v368_v53 = vmax.f32 %v231_v43, 0.0  ;;  %v416_v5 = vmax.f32 %v351_v63, 0.0 }
  0xfc   :  { %v423_v56 = vpack.c.bf16 %v367_v47, %v365_v46  ;;  %v1714_v8 = vpack.c.bf16 %v415_v3, %v413_v57 }
  0xfd   :  { %v424_v60 = vpack.c.bf16 %v368_v53, %v366_v52  ;;  %v234_v61 = vpop.f32.mrb[16].mxu0  ;;  %v1717_v12 = vpack.c.bf16 %v416_v5, %v414_v62 }
  0xfe   :  { %v235_v0 = vadd.f32 %v234_v61, %v1654_v10  ;;  %v236_v2 = vpop.f32.mrb[17].mxu0 }
  0xff   :  { %v237_v1 = vadd.f32 %v236_v2, %v1656_v11  ;;  %v238_v4 = vpop.f32.mrb[18].mxu0  ;;  %640 = vmatprep.mubr.bf16.mxu1 %v424_v60 }
 0x100   :  { %v239_v6 = vadd.f32 %v238_v4, %v1654_v10  ;;  %v240_v7 = vpop.f32.mrb[19].mxu0  ;;  %641 = vmatmul.mubr.bf16.gmra.mrb[28].mxu1 %v423_v56  ;;  %v369_v13 = vmax.f32 %v235_v0, 0.0 }
 0x101   :  { %v241_v9 = vadd.f32 %v240_v7, %v1656_v11  ;;  %v370_v17 = vmax.f32 %v237_v1, 0.0 }
 0x102   :  { %v371_v15 = vmax.f32 %v239_v6, 0.0 }
 0x103   :  { %v372_v18 = vmax.f32 %v241_v9, 0.0 }
 0x104   :  { %v425_v19 = vpack.c.bf16 %v371_v15, %v369_v13 }
 0x105   :  { %v426_v20 = vpack.c.bf16 %v372_v18, %v370_v17  ;;  %v244_v21 = vpop.f32.mrb[20].mxu0 }
 0x106   :  { %v245_v22 = vadd.f32 %v244_v21, %v1654_v10  ;;  %v246_v23 = vpop.f32.mrb[21].mxu0 }
 0x107   :  { %v247_v24 = vadd.f32 %v246_v23, %v1656_v11  ;;  %v248_v25 = vpop.f32.mrb[22].mxu0  ;;  %648 = vmatprep.mubr.bf16.mxu1 %v426_v20 }
 0x108   :  { %v249_v26 = vadd.f32 %v248_v25, %v1654_v10  ;;  %v250_v27 = vpop.f32.mrb[23].mxu0  ;;  %649 = vmatmul.mubr.bf16.gmra.mrb[32].mxu1 %v425_v19  ;;  %v373_v29 = vmax.f32 %v245_v22, 0.0 }
 0x109   :  { %v251_v28 = vadd.f32 %v250_v27, %v1656_v11  ;;  %v374_v31 = vmax.f32 %v247_v24, 0.0 }
 0x10a   :  { %v375_v30 = vmax.f32 %v249_v26, 0.0 }
 0x10b   :  { %v376_v32 = vmax.f32 %v251_v28, 0.0 }
 0x10c   :  { %v427_v33 = vpack.c.bf16 %v375_v30, %v373_v29 }
 0x10d   :  { %v428_v34 = vpack.c.bf16 %v376_v32, %v374_v31  ;;  %v254_v35 = vpop.f32.mrb[24].mxu0 }
 0x10e   :  { %v255_v36 = vadd.f32 %v254_v35, %v1654_v10  ;;  %v256_v37 = vpop.f32.mrb[25].mxu0 }
 0x10f   :  { %v257_v38 = vadd.f32 %v256_v37, %v1656_v11  ;;  %v258_v39 = vpop.f32.mrb[26].mxu0  ;;  %656 = vmatprep.mubr.bf16.mxu1 %v428_v34 }
 0x110   :  { %v259_v40 = vadd.f32 %v258_v39, %v1654_v10  ;;  %v260_v41 = vpop.f32.mrb[27].mxu0  ;;  %657 = vmatmul.mubr.bf16.gmra.mrb[36].mxu1 %v427_v33  ;;  %v377_v45 = vmax.f32 %v255_v36, 0.0 }
 0x111   :  { %v261_v43 = vadd.f32 %v260_v41, %v1656_v11  ;;  %v378_v47 = vmax.f32 %v257_v38, 0.0 }
 0x112   :  { %v379_v46 = vmax.f32 %v259_v40, 0.0 }
 0x113   :  { %v380_v49 = vmax.f32 %v261_v43, 0.0 }
 0x114   :  { %v429_v51 = vpack.c.bf16 %v379_v46, %v377_v45 }
 0x115   :  { %v430_v52 = vpack.c.bf16 %v380_v49, %v378_v47  ;;  %v264_v53 = vpop.f32.mrb[28].mxu0 }
 0x116   :  { %v265_v54 = vadd.f32 %v264_v53, %v1654_v10  ;;  %v266_v55 = vpop.f32.mrb[29].mxu0 }
 0x117   :  { %v267_v56 = vadd.f32 %v266_v55, %v1656_v11  ;;  %v268_v57 = vpop.f32.mrb[30].mxu0  ;;  %664 = vmatprep.mubr.bf16.mxu1 %v430_v52 }
 0x118   :  { %v269_v58 = vadd.f32 %v268_v57, %v1654_v10  ;;  %v270_v59 = vpop.f32.mrb[31].mxu0  ;;  %665 = vmatmul.mubr.bf16.gmra.mrb[40].mxu1 %v429_v51  ;;  %v381_v61 = vmax.f32 %v265_v54, 0.0 }
 0x119   :  { %v271_v60 = vadd.f32 %v270_v59, %v1656_v11  ;;  %v382_v63 = vmax.f32 %v267_v56, 0.0 }
 0x11a   :  { %v383_v62 = vmax.f32 %v269_v58, 0.0 }
 0x11b   :  { %v384_v0 = vmax.f32 %v271_v60, 0.0 }
 0x11c   :  { %v431_v2 = vpack.c.bf16 %v383_v62, %v381_v61 }
 0x11d   :  { %v432_v3 = vpack.c.bf16 %v384_v0, %v382_v63  ;;  %v274_v1 = vpop.f32.mrb[32].mxu0  ;;  %v1353_v63 = vld [vmem:[%s1944_s5 + $0x18] sm:$0xff]  }
 0x11e   :  { %v275_v4 = vadd.f32 %v274_v1, %v1654_v10  ;;  %v276_v5 = vpop.f32.mrb[33].mxu0  ;;  %1281 = vmatprep.subr.bf16.mxu0 %v1353_v63 }
 0x11f   :  { %v277_v6 = vadd.f32 %v276_v5, %v1656_v11  ;;  %v278_v7 = vpop.f32.mrb[34].mxu0  ;;  %672 = vmatprep.mubr.bf16.mxu1 %v432_v3  ;;  %1282 = vmatpush3.bf16.msra.mxu0 %v1353_v63 }
 0x120   :  { %v279_v9 = vadd.f32 %v278_v7, %v1654_v10  ;;  %v280_v13 = vpop.f32.mrb[35].mxu0  ;;  %673 = vmatmul.mubr.bf16.gmra.mrb[44].mxu1 %v431_v2  ;;  %v385_v17 = vmax.f32 %v275_v4, 0.0 }
 0x121   :  { %v281_v15 = vadd.f32 %v280_v13, %v1656_v11  ;;  %v386_v19 = vmax.f32 %v277_v6, 0.0  ;;  %v1356_v6 = vld [vmem:[%s1944_s5 + $0x30] sm:$0xff]  }
 0x122   :  { %v387_v18 = vmax.f32 %v279_v9, 0.0 }
 0x123   :  { %v388_v20 = vmax.f32 %v281_v15, 0.0 }
 0x124   :  { %v433_v21 = vpack.c.bf16 %v387_v18, %v385_v17 }
 0x125   :  { %v434_v22 = vpack.c.bf16 %v388_v20, %v386_v19  ;;  %v284_v23 = vpop.f32.mrb[36].mxu0 }
 0x126   :  { %v285_v24 = vadd.f32 %v284_v23, %v1654_v10  ;;  %v286_v25 = vpop.f32.mrb[37].mxu0 }
 0x127   :  { %v287_v26 = vadd.f32 %v286_v25, %v1656_v11  ;;  %v288_v27 = vpop.f32.mrb[38].mxu0  ;;  %680 = vmatprep.mubr.bf16.mxu1 %v434_v22 }
 0x128   :  { %v289_v28 = vadd.f32 %v288_v27, %v1654_v10  ;;  %v290_v29 = vpop.f32.mrb[39].mxu0  ;;  %681 = vmatmul.mubr.bf16.gmra.mrb[48].mxu1 %v433_v21  ;;  %v389_v31 = vmax.f32 %v285_v24, 0.0 }
 0x129   :  { %v291_v30 = vadd.f32 %v290_v29, %v1656_v11  ;;  %v390_v33 = vmax.f32 %v287_v26, 0.0 }
 0x12a   :  { %v391_v32 = vmax.f32 %v289_v28, 0.0 }
 0x12b   :  { %v392_v34 = vmax.f32 %v291_v30, 0.0 }
 0x12c   :  { %v435_v35 = vpack.c.bf16 %v391_v32, %v389_v31 }
 0x12d   :  { %v436_v36 = vpack.c.bf16 %v392_v34, %v390_v33  ;;  %v294_v37 = vpop.f32.mrb[40].mxu0 }
 0x12e   :  { %v295_v38 = vadd.f32 %v294_v37, %v1654_v10  ;;  %v296_v39 = vpop.f32.mrb[41].mxu0 }
 0x12f   :  { %v297_v40 = vadd.f32 %v296_v39, %v1656_v11  ;;  %v298_v41 = vpop.f32.mrb[42].mxu0  ;;  %688 = vmatprep.mubr.bf16.mxu1 %v436_v36 }
 0x130   :  { %v299_v43 = vadd.f32 %v298_v41, %v1654_v10  ;;  %v300_v45 = vpop.f32.mrb[43].mxu0  ;;  %689 = vmatmul.mubr.bf16.gmra.mrb[52].mxu1 %v435_v35  ;;  %v393_v47 = vmax.f32 %v295_v38, 0.0 }
 0x131   :  { %v301_v46 = vadd.f32 %v300_v45, %v1656_v11  ;;  %v394_v51 = vmax.f32 %v297_v40, 0.0 }
 0x132   :  { %v395_v49 = vmax.f32 %v299_v43, 0.0 }
 0x133   :  { %v396_v52 = vmax.f32 %v301_v46, 0.0 }
 0x134   :  { %v437_v53 = vpack.c.bf16 %v395_v49, %v393_v47 }
 0x135   :  { %v438_v54 = vpack.c.bf16 %v396_v52, %v394_v51  ;;  %v304_v55 = vpop.f32.mrb[44].mxu0 }
 0x136   :  { %v305_v56 = vadd.f32 %v304_v55, %v1654_v10  ;;  %v306_v57 = vpop.f32.mrb[45].mxu0 }
 0x137   :  { %v307_v58 = vadd.f32 %v306_v57, %v1656_v11  ;;  %v308_v59 = vpop.f32.mrb[46].mxu0  ;;  %696 = vmatprep.mubr.bf16.mxu1 %v438_v54 }
 0x138   :  { %v309_v60 = vadd.f32 %v308_v59, %v1654_v10  ;;  %v310_v61 = vpop.f32.mrb[47].mxu0  ;;  %697 = vmatmul.mubr.bf16.gmra.mrb[56].mxu1 %v437_v53  ;;  %v397_v0 = vmax.f32 %v305_v56, 0.0  ;;  %v1354_v10 = vld [vmem:[%s1944_s5 + $0x20] sm:$0xff]  }
 0x139   :  { %v311_v62 = vadd.f32 %v310_v61, %v1656_v11  ;;  %v398_v3 = vmax.f32 %v307_v58, 0.0  ;;  %1283 = vmatprep.subr.bf16.mxu0 %v1354_v10  ;;  %v1355_v11 = vld [vmem:[%s1944_s5 + $0x28] sm:$0xff]  }
 0x13a   :  { %v399_v2 = vmax.f32 %v309_v60, 0.0  ;;  %1284 = vmatpush3.bf16.msra.mxu0 %v1354_v10 }
 0x13b   :  { %v400_v1 = vmax.f32 %v311_v62, 0.0  ;;  %1285 = vmatprep.subr.bf16.mxu0 %v1355_v11 }
 0x13c   :  { %v439_v4 = vpack.c.bf16 %v399_v2, %v397_v0 }
 0x13d   :  { %v440_v5 = vpack.c.bf16 %v400_v1, %v398_v3 }
 0x13e   :  { %1286 = vmatpush3.bf16.msra.mxu0 %v1355_v11 }
 0x13f   :  { %704 = vmatprep.mubr.bf16.mxu1 %v440_v5  ;;  %1287 = vmatprep.subr.bf16.mxu0 %v1356_v6 }
 0x140   :  { %705 = vmatmul.mubr.bf16.gmra.mrb[60].mxu1 %v439_v4 }
 0x141   :  { %712 = vmatprep.mubr.bf16.mxu1 %v1681_v50  ;;  %v1357_v50 = vld [vmem:[%s1944_s5 + $0x38] sm:$0xff]  }
 0x142   :  { %1288 = vmatpush3.bf16.msra.mxu0 %v1356_v6 }
 0x143   :  { %1289 = vmatprep.subr.bf16.mxu0 %v1357_v50 }
 0x146   :  { %1290 = vmatpush3.bf16.msra.mxu0 %v1357_v50 }
 0x148   :  { %713 = vmatmul.mubr.bf16.gmra.mrb[64].mxu1 %v1678_v48 }
 0x149   :  { %720 = vmatprep.mubr.bf16.mxu1 %v1693_v16  ;;  %v1773_v16 = vld [vmem:[%s1945_s4] ss:$0 sm:$0xff] }
 0x150   :  { %721 = vmatmul.mubr.bf16.gmra.mrb[68].mxu1 %v1690_v14 }
 0x151   :  { %728 = vmatprep.mubr.bf16.mxu1 %v1705_v44 }
 0x158   :  { %729 = vmatmul.mubr.bf16.gmra.mrb[72].mxu1 %v1702_v42 }
 0x159   :  { %736 = vmatprep.mubr.bf16.mxu1 %v1717_v12 }
 0x160   :  { %737 = vmatmul.mubr.bf16.gmra.mrb[76].mxu1 %v1714_v8 }
 0x1bb   :  { %v1155_v48 = vpop.f32.mrb[16].mxu1 }
 0x1bc   :  { %v1156_v7 = vpop.f32.mrb[17].mxu1 }
 0x1bd   :  { %v1157_v9 = vadd.f32 %v1156_v7, %v1155_v48  ;;  %v1158_v13 = vpop.f32.mrb[18].mxu1 }
 0x1be   :  { %v1159_v15 = vpop.f32.mrb[19].mxu1 }
 0x1bf   :  { %v619_v14 = vadd.f32 %v1157_v9, %v1773_v16  ;;  %v1160_v17 = vadd.f32 %v1159_v15, %v1158_v13 }
 0x1c1   :  { %v622_v44 = vadd.f32 %v1160_v17, %v1773_v16  ;;  %v745_v42 = vmax.f32 %v619_v14, 0.0 }
 0x1c3   :  { %v746_v18 = vmax.f32 %v622_v44, 0.0  ;;  %v1161_v12 = vpop.f32.mrb[20].mxu1 }
 0x1c4   :  { %v1162_v19 = vpop.f32.mrb[21].mxu1 }
 0x1c5   :  { %v1163_v8 = vadd.f32 %v1162_v19, %v1161_v12  ;;  %v1164_v20 = vpop.f32.mrb[22].mxu1  ;;  %v777_v21 = vpack.c.bf16 %v746_v18, %v745_v42 }
 0x1c6   :  { %v1165_v22 = vpop.f32.mrb[23].mxu1 }
 0x1c7   :  { %v627_v23 = vadd.f32 %v1163_v8, %v1773_v16  ;;  %v1166_v24 = vadd.f32 %v1165_v22, %v1164_v20  ;;  %1291 = vmatprep.mubr.bf16.mxu0 %v777_v21 }
 0x1c9   :  { %v630_v25 = vadd.f32 %v1166_v24, %v1773_v16  ;;  %v747_v26 = vmax.f32 %v627_v23, 0.0 }
 0x1cb   :  { %v748_v27 = vmax.f32 %v630_v25, 0.0  ;;  %v1167_v28 = vpop.f32.mrb[24].mxu1 }
 0x1cc   :  { %v1168_v29 = vpop.f32.mrb[25].mxu1 }
 0x1cd   :  { %v778_v30 = vpack.c.bf16 %v748_v27, %v747_v26  ;;  %v1169_v31 = vadd.f32 %v1168_v29, %v1167_v28  ;;  %v1170_v32 = vpop.f32.mrb[26].mxu1 }
 0x1ce   :  { %v1171_v33 = vpop.f32.mrb[27].mxu1 }
 0x1cf   :  { %v635_v34 = vadd.f32 %v1169_v31, %v1773_v16  ;;  %v1172_v35 = vadd.f32 %v1171_v33, %v1170_v32  ;;  %1292 = vmatmul.mubr.bf16.vlgmr.msra.gmra.mrb[48].mxu0 %v778_v30 }
 0x1d1   :  { %v638_v36 = vadd.f32 %v1172_v35, %v1773_v16  ;;  %v749_v37 = vmax.f32 %v635_v34, 0.0 }
 0x1d3   :  { %v750_v38 = vmax.f32 %v638_v36, 0.0  ;;  %v1173_v39 = vpop.f32.mrb[28].mxu1 }
 0x1d4   :  { %v1174_v40 = vpop.f32.mrb[29].mxu1 }
 0x1d5   :  { %v1175_v41 = vadd.f32 %v1174_v40, %v1173_v39  ;;  %v1176_v43 = vpop.f32.mrb[30].mxu1  ;;  %v779_v45 = vpack.c.bf16 %v750_v38, %v749_v37 }
 0x1d6   :  { %v1177_v46 = vpop.f32.mrb[31].mxu1 }
 0x1d7   :  { %v643_v47 = vadd.f32 %v1175_v41, %v1773_v16  ;;  %v1178_v49 = vadd.f32 %v1177_v46, %v1176_v43  ;;  %1295 = vmatprep.mubr.bf16.mxu0 %v779_v45 }
 0x1d9   :  { %v646_v51 = vadd.f32 %v1178_v49, %v1773_v16  ;;  %v751_v52 = vmax.f32 %v643_v47, 0.0 }
 0x1db   :  { %v752_v53 = vmax.f32 %v646_v51, 0.0  ;;  %v1179_v54 = vpop.f32.mrb[32].mxu1 }
 0x1dc   :  { %v1180_v55 = vpop.f32.mrb[33].mxu1 }
 0x1dd   :  { %v1181_v56 = vadd.f32 %v1180_v55, %v1179_v54  ;;  %v1182_v57 = vpop.f32.mrb[34].mxu1  ;;  %v780_v58 = vpack.c.bf16 %v752_v53, %v751_v52 }
 0x1de   :  { %v1183_v59 = vpop.f32.mrb[35].mxu1 }
 0x1df   :  { %v651_v60 = vadd.f32 %v1181_v56, %v1773_v16  ;;  %v1184_v61 = vadd.f32 %v1183_v59, %v1182_v57  ;;  %1296 = vmatmul.mubr.bf16.gmra.mrb[52].mxu0 %v780_v58 }
 0x1e1   :  { %v654_v62 = vadd.f32 %v1184_v61, %v1773_v16  ;;  %v753_v63 = vmax.f32 %v651_v60, 0.0 }
 0x1e3   :  { %v754_v0 = vmax.f32 %v654_v62, 0.0  ;;  %v1185_v2 = vpop.f32.mrb[36].mxu1 }
 0x1e4   :  { %v1186_v3 = vpop.f32.mrb[37].mxu1 }
 0x1e5   :  { %v1187_v1 = vadd.f32 %v1186_v3, %v1185_v2  ;;  %v1188_v4 = vpop.f32.mrb[38].mxu1  ;;  %v781_v5 = vpack.c.bf16 %v754_v0, %v753_v63 }
 0x1e6   :  { %v1189_v10 = vpop.f32.mrb[39].mxu1 }
 0x1e7   :  { %v659_v11 = vadd.f32 %v1187_v1, %v1773_v16  ;;  %v1190_v6 = vadd.f32 %v1189_v10, %v1188_v4  ;;  %1299 = vmatprep.mubr.bf16.mxu0 %v781_v5 }
 0x1e9   :  { %v662_v50 = vadd.f32 %v1190_v6, %v1773_v16  ;;  %v755_v48 = vmax.f32 %v659_v11, 0.0 }
 0x1eb   :  { %v756_v7 = vmax.f32 %v662_v50, 0.0  ;;  %v1191_v9 = vpop.f32.mrb[40].mxu1 }
 0x1ec   :  { %v1192_v13 = vpop.f32.mrb[41].mxu1 }
 0x1ed   :  { %v1193_v15 = vadd.f32 %v1192_v13, %v1191_v9  ;;  %v1194_v14 = vpop.f32.mrb[42].mxu1  ;;  %v782_v17 = vpack.c.bf16 %v756_v7, %v755_v48 }
 0x1ee   :  { %v1195_v44 = vpop.f32.mrb[43].mxu1 }
 0x1ef   :  { %v667_v42 = vadd.f32 %v1193_v15, %v1773_v16  ;;  %v1196_v18 = vadd.f32 %v1195_v44, %v1194_v14  ;;  %1300 = vmatmul.mubr.bf16.gmra.mrb[56].mxu0 %v782_v17 }
 0x1f1   :  { %v670_v12 = vadd.f32 %v1196_v18, %v1773_v16  ;;  %v757_v19 = vmax.f32 %v667_v42, 0.0 }
 0x1f3   :  { %v758_v8 = vmax.f32 %v670_v12, 0.0  ;;  %v1197_v20 = vpop.f32.mrb[44].mxu1 }
 0x1f4   :  { %v1198_v21 = vpop.f32.mrb[45].mxu1 }
 0x1f5   :  { %v1199_v22 = vadd.f32 %v1198_v21, %v1197_v20  ;;  %v1200_v23 = vpop.f32.mrb[46].mxu1  ;;  %v783_v24 = vpack.c.bf16 %v758_v8, %v757_v19 }
 0x1f6   :  { %v1201_v25 = vpop.f32.mrb[47].mxu1 }
 0x1f7   :  { %v675_v26 = vadd.f32 %v1199_v22, %v1773_v16  ;;  %v1202_v27 = vadd.f32 %v1201_v25, %v1200_v23  ;;  %1303 = vmatprep.mubr.bf16.mxu0 %v783_v24 }
 0x1f9   :  { %v678_v28 = vadd.f32 %v1202_v27, %v1773_v16  ;;  %v759_v29 = vmax.f32 %v675_v26, 0.0 }
 0x1fb   :  { %v760_v30 = vmax.f32 %v678_v28, 0.0  ;;  %v1203_v31 = vpop.f32.mrb[48].mxu1 }
 0x1fc   :  { %v1204_v32 = vpop.f32.mrb[49].mxu1 }
 0x1fd   :  { %v1205_v33 = vadd.f32 %v1204_v32, %v1203_v31  ;;  %v1206_v34 = vpop.f32.mrb[50].mxu1  ;;  %v784_v35 = vpack.c.bf16 %v760_v30, %v759_v29 }
 0x1fe   :  { %v1207_v36 = vpop.f32.mrb[51].mxu1 }
 0x1ff   :  { %v683_v37 = vadd.f32 %v1205_v33, %v1773_v16  ;;  %v1208_v38 = vadd.f32 %v1207_v36, %v1206_v34  ;;  %1304 = vmatmul.mubr.bf16.gmra.mrb[60].mxu0 %v784_v35 }
 0x201   :  { %v686_v39 = vadd.f32 %v1208_v38, %v1773_v16  ;;  %v761_v40 = vmax.f32 %v683_v37, 0.0 }
 0x203   :  { %v762_v41 = vmax.f32 %v686_v39, 0.0  ;;  %v1209_v43 = vpop.f32.mrb[52].mxu1 }
 0x204   :  { %v1210_v45 = vpop.f32.mrb[53].mxu1 }
 0x205   :  { %v1211_v46 = vadd.f32 %v1210_v45, %v1209_v43  ;;  %v1212_v47 = vpop.f32.mrb[54].mxu1  ;;  %v785_v49 = vpack.c.bf16 %v762_v41, %v761_v40 }
 0x206   :  { %v1213_v51 = vpop.f32.mrb[55].mxu1 }
 0x207   :  { %v691_v52 = vadd.f32 %v1211_v46, %v1773_v16  ;;  %v1214_v53 = vadd.f32 %v1213_v51, %v1212_v47  ;;  %1307 = vmatprep.mubr.bf16.mxu0 %v785_v49 }
 0x209   :  { %v694_v54 = vadd.f32 %v1214_v53, %v1773_v16  ;;  %v763_v55 = vmax.f32 %v691_v52, 0.0 }
 0x20b   :  { %v764_v56 = vmax.f32 %v694_v54, 0.0  ;;  %v1215_v57 = vpop.f32.mrb[56].mxu1 }
 0x20c   :  { %v1216_v58 = vpop.f32.mrb[57].mxu1 }
 0x20d   :  { %v1217_v59 = vadd.f32 %v1216_v58, %v1215_v57  ;;  %v1218_v60 = vpop.f32.mrb[58].mxu1  ;;  %v786_v61 = vpack.c.bf16 %v764_v56, %v763_v55 }
 0x20e   :  { %v1219_v62 = vpop.f32.mrb[59].mxu1 }
 0x20f   :  { %v699_v63 = vadd.f32 %v1217_v59, %v1773_v16  ;;  %v1220_v0 = vadd.f32 %v1219_v62, %v1218_v60  ;;  %1308 = vmatmul.mubr.bf16.gmra.mrb[64].mxu0 %v786_v61  ;;  %v1810_v61 = vld [vmem:[%s1946_s6] ss:$0 sm:$0xff] }
 0x211   :  { %v702_v2 = vadd.f32 %v1220_v0, %v1773_v16  ;;  %v765_v3 = vmax.f32 %v699_v63, 0.0 }
 0x213   :  { %v766_v1 = vmax.f32 %v702_v2, 0.0  ;;  %v1221_v4 = vpop.f32.mrb[60].mxu1 }
 0x214   :  { %v1222_v5 = vpop.f32.mrb[61].mxu1 }
 0x215   :  { %v1223_v10 = vadd.f32 %v1222_v5, %v1221_v4  ;;  %v1224_v11 = vpop.f32.mrb[62].mxu1  ;;  %v787_v6 = vpack.c.bf16 %v766_v1, %v765_v3 }
 0x216   :  { %v1225_v50 = vpop.f32.mrb[63].mxu1 }
 0x217   :  { %v707_v48 = vadd.f32 %v1223_v10, %v1773_v16  ;;  %v1226_v7 = vadd.f32 %v1225_v50, %v1224_v11  ;;  %1311 = vmatprep.mubr.bf16.mxu0 %v787_v6 }
 0x219   :  { %v710_v9 = vadd.f32 %v1226_v7, %v1773_v16  ;;  %v767_v13 = vmax.f32 %v707_v48, 0.0 }
 0x21b   :  { %v768_v15 = vmax.f32 %v710_v9, 0.0  ;;  %v1227_v14 = vpop.f32.mrb[64].mxu1 }
 0x21c   :  { %v1228_v17 = vpop.f32.mrb[65].mxu1 }
 0x21d   :  { %v1229_v44 = vadd.f32 %v1228_v17, %v1227_v14  ;;  %v1230_v42 = vpop.f32.mrb[66].mxu1  ;;  %v788_v18 = vpack.c.bf16 %v768_v15, %v767_v13 }
 0x21e   :  { %v1231_v12 = vpop.f32.mrb[67].mxu1 }
 0x21f   :  { %v715_v19 = vadd.f32 %v1229_v44, %v1773_v16  ;;  %v1232_v8 = vadd.f32 %v1231_v12, %v1230_v42  ;;  %1312 = vmatmul.mubr.bf16.gmra.mrb[68].mxu0 %v788_v18 }
 0x221   :  { %v718_v20 = vadd.f32 %v1232_v8, %v1773_v16  ;;  %v769_v21 = vmax.f32 %v715_v19, 0.0 }
 0x223   :  { %v770_v22 = vmax.f32 %v718_v20, 0.0  ;;  %v1233_v23 = vpop.f32.mrb[68].mxu1 }
 0x224   :  { %v1234_v24 = vpop.f32.mrb[69].mxu1 }
 0x225   :  { %v1235_v25 = vadd.f32 %v1234_v24, %v1233_v23  ;;  %v1236_v26 = vpop.f32.mrb[70].mxu1  ;;  %v789_v27 = vpack.c.bf16 %v770_v22, %v769_v21 }
 0x226   :  { %v1237_v28 = vpop.f32.mrb[71].mxu1 }
 0x227   :  { %v723_v29 = vadd.f32 %v1235_v25, %v1773_v16  ;;  %v1238_v30 = vadd.f32 %v1237_v28, %v1236_v26  ;;  %1315 = vmatprep.mubr.bf16.mxu0 %v789_v27 }
 0x229   :  { %v726_v31 = vadd.f32 %v1238_v30, %v1773_v16  ;;  %v771_v32 = vmax.f32 %v723_v29, 0.0 }
 0x22b   :  { %v772_v33 = vmax.f32 %v726_v31, 0.0  ;;  %v1239_v34 = vpop.f32.mrb[72].mxu1 }
 0x22c   :  { %v1240_v35 = vpop.f32.mrb[73].mxu1 }
 0x22d   :  { %v1241_v36 = vadd.f32 %v1240_v35, %v1239_v34  ;;  %v1242_v37 = vpop.f32.mrb[74].mxu1  ;;  %v790_v38 = vpack.c.bf16 %v772_v33, %v771_v32 }
 0x22e   :  { %v1243_v39 = vpop.f32.mrb[75].mxu1 }
 0x22f   :  { %v731_v40 = vadd.f32 %v1241_v36, %v1773_v16  ;;  %v1244_v41 = vadd.f32 %v1243_v39, %v1242_v37  ;;  %1316 = vmatmul.mubr.bf16.gmra.mrb[72].mxu0 %v790_v38 }
 0x231   :  { %v734_v43 = vadd.f32 %v1244_v41, %v1773_v16  ;;  %v773_v45 = vmax.f32 %v731_v40, 0.0 }
 0x233   :  { %v774_v46 = vmax.f32 %v734_v43, 0.0  ;;  %v1245_v47 = vpop.f32.mrb[76].mxu1 }
 0x234   :  { %v1246_v49 = vpop.f32.mrb[77].mxu1 }
 0x235   :  { %v1247_v51 = vadd.f32 %v1246_v49, %v1245_v47  ;;  %v1248_v52 = vpop.f32.mrb[78].mxu1  ;;  %v791_v53 = vpack.c.bf16 %v774_v46, %v773_v45 }
 0x236   :  { %v1249_v54 = vpop.f32.mrb[79].mxu1 }
 0x237   :  { %v739_v55 = vadd.f32 %v1247_v51, %v1773_v16  ;;  %v1250_v56 = vadd.f32 %v1249_v54, %v1248_v52  ;;  %1319 = vmatprep.mubr.bf16.mxu0 %v791_v53 }
 0x239   :  { %v742_v57 = vadd.f32 %v1250_v56, %v1773_v16  ;;  %v775_v58 = vmax.f32 %v739_v55, 0.0 }
 0x23b   :  { %v776_v59 = vmax.f32 %v742_v57, 0.0 }
 0x23d   :  { %v792_v60 = vpack.c.bf16 %v776_v59, %v775_v58 }
 0x23f   :  { %1320 = vmatmul.mubr.bf16.gmra.mrb[76].mxu0 %v792_v60 }
 0x2a2   :  { %v1293_v62 = vpop.f32.mrb[48].mxu0 }
 0x2a3   :  { %v907_v63 = vadd.f32 %v1293_v62, %v1810_v61  ;;  %v898_v0 = vpop.f32.mrb[49].mxu0 }
 0x2a4   :  { %v899_v2 = vadd.f32 %v1810_v61, %v898_v0  ;;  %v1294_v3 = vpop.f32.mrb[50].mxu0 }
 0x2a5   :  { %1358 = vtanh.f32 %v907_v63  ;;  %v910_v1 = vadd.f32 %v1294_v3, %v1810_v61  ;;  %v901_v16 = vpop.f32.mrb[51].mxu0 }
 0x2a6   :  { %1360 = vtanh.f32 %v899_v2  ;;  %v902_v4 = vadd.f32 %v1810_v61, %v901_v16 }
 0x2a7   :  { %1362 = vtanh.f32 %v910_v1 }
 0x2a8   :  { %1364 = vtanh.f32 %v902_v4 }
 0x2af   :  { %v1359_v5 = vpop.eup %1358 }
 0x2b0   :  { %v1361_v10 = vpop.eup %1360  ;;  %1059 = vst [vmem:[%s1947_s7 + $0x10] sm:$0xff] %v1359_v5 }
 0x2b1   :  { %v1363_v11 = vpop.eup %1362  ;;  %1057 = vst [vmem:[%s1947_s7] sm:$0xff] %v1361_v10 }
 0x2b2   :  { %v1365_v6 = vpop.eup %1364  ;;  %1060 = vst [vmem:[%s1947_s7 + $0x18] sm:$0xff] %v1363_v11  ;;  %v1297_v50 = vpop.f32.mrb[52].mxu0 }
 0x2b3   :  { %1058 = vst [vmem:[%s1947_s7 + $0x8] sm:$0xff] %v1365_v6  ;;  %v923_v48 = vadd.f32 %v1297_v50, %v1810_v61  ;;  %v914_v7 = vpop.f32.mrb[53].mxu0 }
 0x2b4   :  { %v915_v9 = vadd.f32 %v1810_v61, %v914_v7  ;;  %v1298_v13 = vpop.f32.mrb[54].mxu0 }
 0x2b5   :  { %1366 = vtanh.f32 %v923_v48  ;;  %v926_v15 = vadd.f32 %v1298_v13, %v1810_v61  ;;  %v917_v14 = vpop.f32.mrb[55].mxu0 }
 0x2b6   :  { %1368 = vtanh.f32 %v915_v9  ;;  %v918_v17 = vadd.f32 %v1810_v61, %v917_v14 }
 0x2b7   :  { %1370 = vtanh.f32 %v926_v15 }
 0x2b8   :  { %1372 = vtanh.f32 %v918_v17 }
 0x2bf   :  { %v1367_v44 = vpop.eup %1366 }
 0x2c0   :  { %v1369_v42 = vpop.eup %1368  ;;  %1063 = vst [vmem:[%s1947_s7 + $0x30] sm:$0xff] %v1367_v44 }
 0x2c1   :  { %v1371_v18 = vpop.eup %1370  ;;  %1061 = vst [vmem:[%s1947_s7 + $0x20] sm:$0xff] %v1369_v42 }
 0x2c2   :  { %v1373_v12 = vpop.eup %1372  ;;  %1064 = vst [vmem:[%s1947_s7 + $0x38] sm:$0xff] %v1371_v18  ;;  %v1301_v19 = vpop.f32.mrb[56].mxu0 }
 0x2c3   :  { %1062 = vst [vmem:[%s1947_s7 + $0x28] sm:$0xff] %v1373_v12  ;;  %v939_v8 = vadd.f32 %v1301_v19, %v1810_v61  ;;  %v930_v20 = vpop.f32.mrb[57].mxu0 }
 0x2c4   :  { %v931_v21 = vadd.f32 %v1810_v61, %v930_v20  ;;  %v1302_v22 = vpop.f32.mrb[58].mxu0 }
 0x2c5   :  { %1374 = vtanh.f32 %v939_v8  ;;  %v942_v23 = vadd.f32 %v1302_v22, %v1810_v61  ;;  %v933_v24 = vpop.f32.mrb[59].mxu0 }
 0x2c6   :  { %1376 = vtanh.f32 %v931_v21  ;;  %v934_v25 = vadd.f32 %v1810_v61, %v933_v24 }
 0x2c7   :  { %1378 = vtanh.f32 %v942_v23 }
 0x2c8   :  { %1380 = vtanh.f32 %v934_v25 }
 0x2cf   :  { %v1375_v26 = vpop.eup %1374 }
 0x2d0   :  { %v1377_v27 = vpop.eup %1376  ;;  %1067 = vst [vmem:[%s1947_s7 + $0x50] sm:$0xff] %v1375_v26 }
 0x2d1   :  { %v1379_v28 = vpop.eup %1378  ;;  %1065 = vst [vmem:[%s1947_s7 + $0x40] sm:$0xff] %v1377_v27 }
 0x2d2   :  { %v1381_v29 = vpop.eup %1380  ;;  %1068 = vst [vmem:[%s1947_s7 + $0x58] sm:$0xff] %v1379_v28  ;;  %v1305_v30 = vpop.f32.mrb[60].mxu0 }
 0x2d3   :  { %1066 = vst [vmem:[%s1947_s7 + $0x48] sm:$0xff] %v1381_v29  ;;  %v955_v31 = vadd.f32 %v1305_v30, %v1810_v61  ;;  %v946_v32 = vpop.f32.mrb[61].mxu0 }
 0x2d4   :  { %v947_v33 = vadd.f32 %v1810_v61, %v946_v32  ;;  %v1306_v34 = vpop.f32.mrb[62].mxu0 }
 0x2d5   :  { %1382 = vtanh.f32 %v955_v31  ;;  %v958_v35 = vadd.f32 %v1306_v34, %v1810_v61  ;;  %v949_v36 = vpop.f32.mrb[63].mxu0 }
 0x2d6   :  { %1384 = vtanh.f32 %v947_v33  ;;  %v950_v37 = vadd.f32 %v1810_v61, %v949_v36 }
 0x2d7   :  { %1386 = vtanh.f32 %v958_v35 }
 0x2d8   :  { %1388 = vtanh.f32 %v950_v37 }
 0x2df   :  { %v1383_v38 = vpop.eup %1382 }
 0x2e0   :  { %v1385_v39 = vpop.eup %1384  ;;  %1071 = vst [vmem:[%s1947_s7 + $0x70] sm:$0xff] %v1383_v38 }
 0x2e1   :  { %v1387_v40 = vpop.eup %1386  ;;  %1069 = vst [vmem:[%s1947_s7 + $0x60] sm:$0xff] %v1385_v39 }
 0x2e2   :  { %v1389_v41 = vpop.eup %1388  ;;  %1072 = vst [vmem:[%s1947_s7 + $0x78] sm:$0xff] %v1387_v40  ;;  %v1309_v43 = vpop.f32.mrb[64].mxu0 }
 0x2e3   :  { %1070 = vst [vmem:[%s1947_s7 + $0x68] sm:$0xff] %v1389_v41  ;;  %v971_v45 = vadd.f32 %v1309_v43, %v1810_v61  ;;  %v962_v46 = vpop.f32.mrb[65].mxu0 }
 0x2e4   :  { %v963_v47 = vadd.f32 %v1810_v61, %v962_v46  ;;  %v1310_v49 = vpop.f32.mrb[66].mxu0 }
 0x2e5   :  { %1390 = vtanh.f32 %v971_v45  ;;  %v974_v51 = vadd.f32 %v1310_v49, %v1810_v61  ;;  %v965_v52 = vpop.f32.mrb[67].mxu0 }
 0x2e6   :  { %1392 = vtanh.f32 %v963_v47  ;;  %v966_v53 = vadd.f32 %v1810_v61, %v965_v52 }
 0x2e7   :  { %1394 = vtanh.f32 %v974_v51 }
 0x2e8   :  { %1396 = vtanh.f32 %v966_v53 }
 0x2ef   :  { %v1391_v54 = vpop.eup %1390 }
 0x2f0   :  { %v1393_v55 = vpop.eup %1392  ;;  %1075 = vst [vmem:[%s1947_s7 + $0x90] sm:$0xff] %v1391_v54 }
 0x2f1   :  { %v1395_v56 = vpop.eup %1394  ;;  %1073 = vst [vmem:[%s1947_s7 + $0x80] sm:$0xff] %v1393_v55 }
 0x2f2   :  { %v1397_v57 = vpop.eup %1396  ;;  %1076 = vst [vmem:[%s1947_s7 + $0x98] sm:$0xff] %v1395_v56  ;;  %v1313_v58 = vpop.f32.mrb[68].mxu0 }
 0x2f3   :  { %1074 = vst [vmem:[%s1947_s7 + $0x88] sm:$0xff] %v1397_v57  ;;  %v987_v59 = vadd.f32 %v1313_v58, %v1810_v61  ;;  %v978_v60 = vpop.f32.mrb[69].mxu0 }
 0x2f4   :  { %v979_v62 = vadd.f32 %v1810_v61, %v978_v60  ;;  %v1314_v63 = vpop.f32.mrb[70].mxu0 }
 0x2f5   :  { %1398 = vtanh.f32 %v987_v59  ;;  %v990_v0 = vadd.f32 %v1314_v63, %v1810_v61  ;;  %v981_v2 = vpop.f32.mrb[71].mxu0 }
 0x2f6   :  { %1400 = vtanh.f32 %v979_v62  ;;  %v982_v3 = vadd.f32 %v1810_v61, %v981_v2 }
 0x2f7   :  { %1402 = vtanh.f32 %v990_v0 }
 0x2f8   :  { %1404 = vtanh.f32 %v982_v3 }
 0x2ff   :  { %v1399_v1 = vpop.eup %1398 }
 0x300   :  { %v1401_v16 = vpop.eup %1400  ;;  %1079 = vst [vmem:[%s1947_s7 + $0xb0] sm:$0xff] %v1399_v1 }
 0x301   :  { %v1403_v4 = vpop.eup %1402  ;;  %1077 = vst [vmem:[%s1947_s7 + $0xa0] sm:$0xff] %v1401_v16 }
 0x302   :  { %v1405_v5 = vpop.eup %1404  ;;  %1080 = vst [vmem:[%s1947_s7 + $0xb8] sm:$0xff] %v1403_v4  ;;  %v1317_v10 = vpop.f32.mrb[72].mxu0 }
 0x303   :  { %1078 = vst [vmem:[%s1947_s7 + $0xa8] sm:$0xff] %v1405_v5  ;;  %v1003_v11 = vadd.f32 %v1317_v10, %v1810_v61  ;;  %v994_v6 = vpop.f32.mrb[73].mxu0 }
 0x304   :  { %v995_v50 = vadd.f32 %v1810_v61, %v994_v6  ;;  %v1318_v48 = vpop.f32.mrb[74].mxu0 }
 0x305   :  { %1406 = vtanh.f32 %v1003_v11  ;;  %v1006_v7 = vadd.f32 %v1318_v48, %v1810_v61  ;;  %v997_v9 = vpop.f32.mrb[75].mxu0 }
 0x306   :  { %1408 = vtanh.f32 %v995_v50  ;;  %v998_v13 = vadd.f32 %v1810_v61, %v997_v9 }
 0x307   :  { %1410 = vtanh.f32 %v1006_v7 }
 0x308   :  { %1412 = vtanh.f32 %v998_v13 }
 0x30f   :  { %v1407_v15 = vpop.eup %1406 }
 0x310   :  { %v1409_v14 = vpop.eup %1408  ;;  %1083 = vst [vmem:[%s1947_s7 + $0xd0] sm:$0xff] %v1407_v15 }
 0x311   :  { %v1411_v17 = vpop.eup %1410  ;;  %1081 = vst [vmem:[%s1947_s7 + $0xc0] sm:$0xff] %v1409_v14 }
 0x312   :  { %v1413_v44 = vpop.eup %1412  ;;  %1084 = vst [vmem:[%s1947_s7 + $0xd8] sm:$0xff] %v1411_v17  ;;  %v1321_v42 = vpop.f32.mrb[76].mxu0 }
 0x313   :  { %1082 = vst [vmem:[%s1947_s7 + $0xc8] sm:$0xff] %v1413_v44  ;;  %v1019_v18 = vadd.f32 %v1321_v42, %v1810_v61  ;;  %v1010_v12 = vpop.f32.mrb[77].mxu0 }
 0x314   :  { %v1011_v19 = vadd.f32 %v1810_v61, %v1010_v12  ;;  %v1322_v8 = vpop.f32.mrb[78].mxu0 }
 0x315   :  { %1414 = vtanh.f32 %v1019_v18  ;;  %v1022_v20 = vadd.f32 %v1322_v8, %v1810_v61  ;;  %v1013_v21 = vpop.f32.mrb[79].mxu0 }
 0x316   :  { %1416 = vtanh.f32 %v1011_v19  ;;  %v1014_v22 = vadd.f32 %v1810_v61, %v1013_v21 }
 0x317   :  { %1418 = vtanh.f32 %v1022_v20 }
 0x318   :  { %1420 = vtanh.f32 %v1014_v22 }
 0x31f   :  { %v1415_v23 = vpop.eup %1414 }
 0x320   :  { %v1417_v24 = vpop.eup %1416  ;;  %1087 = vst [vmem:[%s1947_s7 + $0xf0] sm:$0xff] %v1415_v23 }
 0x321   :  { %v1419_v25 = vpop.eup %1418  ;;  %1085 = vst [vmem:[%s1947_s7 + $0xe0] sm:$0xff] %v1417_v24 }
 0x322   :  { %v1421_v26 = vpop.eup %1420  ;;  %1088 = vst [vmem:[%s1947_s7 + $0xf8] sm:$0xff] %v1419_v25 }
 0x323   :  { %1086 = vst [vmem:[%s1947_s7 + $0xe8] sm:$0xff] %v1421_v26 }

</bundles_post_ra>
